<compile_context>
chip_gen: v6e
topology: v6e:2x2x1
jax: 0.10.0
libtpu: 0.0.40
codegen_flags: <defaults>
</compile_context>

<pallas_src>
import math

import jax
import jax.numpy as jnp
from jax.experimental import pallas as pl
from jax.experimental.pallas import tpu as pltpu


def _encoder_map_kernel(m_hbm, out_hbm, copy_sem):
    # m_hbm / out_hbm are raw HBM refs (memory_space=pl.ANY).  forward() just
    # returns M, so the whole op is one bulk HBM -> HBM async copy.
    cp = pltpu.make_async_copy(m_hbm, out_hbm, copy_sem)
    cp.start()
    cp.wait()


def encoder_map_forward(M):
    """Pallas forward of Encoder_map: returns M (shape (n_cell, n_spot))."""
    n_cell, n_spot = M.shape
    nbytes = n_cell * n_spot * jnp.dtype(M.dtype).itemsize

    return pl.pallas_call(
        _encoder_map_kernel,
        out_shape=jax.ShapeDtypeStruct((n_cell, n_spot), M.dtype),
        # Keep both operands in HBM; the kernel drives the DMA itself.
        in_specs=[pl.BlockSpec(memory_space=pl.ANY)],
        out_specs=pl.BlockSpec(memory_space=pl.ANY),
        scratch_shapes=[pltpu.SemaphoreType.DMA(())],
        # Pure passthrough: 0 flops, read + write of M.
        cost_estimate=pl.CostEstimate(
            flops=0, transcendentals=0, bytes_accessed=2 * nbytes
        ),
    )(M)


if __name__ == "__main__":
    # Small demo shapes consistent with the module (n_cell cells x n_spot spots).
    n_cell, n_spot = 64, 512

    key = jax.random.PRNGKey(0)

    # torch.nn.init.xavier_uniform_ on a 2D (n_cell, n_spot) parameter:
    #   fan_out = n_cell, fan_in = n_spot, bound = sqrt(6 / (fan_in + fan_out))
    fan_out, fan_in = n_cell, n_spot
    bound = math.sqrt(6.0 / (fan_in + fan_out))
    M = jax.random.uniform(
        key, (n_cell, n_spot), dtype=jnp.float32, minval=-bound, maxval=bound
    )

    out = encoder_map_forward(M)
    out = jax.block_until_ready(out)

    assert out.shape == (n_cell, n_spot), out.shape
    # forward() returns M unchanged -> exact equality expected.
    assert jnp.array_equal(out, M), "Encoder_map forward must return M unchanged"

    print("KERNEL_OK")
</pallas_src>

<mosaic_0001>
module attributes {stable_mosaic.version = 11 : i64} {
  func.func @_encoder_map_kernel(%arg0: memref<64x512xf32, #tpu.memory_space<any>>, %arg1: memref<64x512xf32, #tpu.memory_space<any>>, %arg2: memref<!tpu.dma_semaphore, #tpu.memory_space<semaphore_mem>>) attributes {dimension_semantics = [], scalar_prefetch = 0 : i64, scratch_operands = 1 : i64, tpu.core_type = #tpu.core_type<tc>} {
    tpu.enqueue_dma source(%arg0 : memref<64x512xf32, #tpu.memory_space<any>>) target(%arg1 : memref<64x512xf32, #tpu.memory_space<any>>) target_semaphore(%arg2 : memref<!tpu.dma_semaphore, #tpu.memory_space<semaphore_mem>>)
    tpu.wait_dma2 semaphore(%arg2 : memref<!tpu.dma_semaphore, #tpu.memory_space<semaphore_mem>>) src(%arg0 : memref<64x512xf32, #tpu.memory_space<any>>) dst(%arg1 : memref<64x512xf32, #tpu.memory_space<any>>)
    return
  }
}

</mosaic_0001>

<bundles_post_ra>
// kernel: tpu_custom_call.1
= control target key start
LH: loop header
LB: loop body
LE: loop exit
PB: predicated region body
PF: predicated region fallthrough
CT: control target
= control target key end

     0   :  { %s29_s6 = smov [#allocation2]   ;;  %s30_s7 = smov 131072   ;;  %s48_s0 = inlined_call_operand.hbm [shape: f32[64,512], index: 0, kind: input, shape index: {}]   ;;  %s49_s1 = inlined_call_operand.hbm [shape: f32[64,512], index: 1, kind: output, shape index: {}]  }
   0x1   :  { %s31_s8 = smov 0  }
   0x2   :  { %12 = dma.general %s48_s0, 4096, %s49_s1, %s29_s6, %s30_s7, [#allocation4], %s31_s8, 0  }
   0x3   :  { %27 = dma.done.wait [#allocation2], 4096 }
   0x4   :  { %28 = vsyncadd [#allocation2], 4294963200 }
   0x5   :  { %17 = vsyncmov [#allocation2] }
   0x8   :  { %s18_s13 = vpop.sfrf %17 }
   0x9   :  { %p23_p0 = scmp.ne.s32.totalorder %s18_s13, 0 }
   0xb   :  { %22 = shalt.err (%p23_p0)  }

</bundles_post_ra>
